<compile_context>
chip_gen: v7x
topology: tpu7x:2x2x1
jax: 0.10.0
libtpu: 0.0.40
codegen_flags: <defaults>
</compile_context>

<pallas_src>
import jax
import jax.numpy as jnp
from jax.experimental import pallas as pl
from jax.experimental.pallas import tpu as pltpu

LANES = 128


def _make_rnn_kernel(S, B, E, H, O, L, V_pad):
    """Kernel body for static sizes (S, B small -> fully unrolled time loop)."""
    # Static row offsets into the packed weight slab (all 8/16-aligned here).
    off_emb = 0
    off_ih0 = V_pad
    off_hh0 = off_ih0 + E
    off_stack = [off_hh0 + H + (l - 1) * 2 * H for l in range(1, L)]
    off_fc = off_hh0 + H + (L - 1) * 2 * H

    def kernel(idx_ref, mat_ref, bias_ref, out_ref):
        f32 = jnp.float32
        bf16 = jnp.bfloat16

        # ---- hoisted weight / bias loads (one load each, reused every step) ---
        emb_w = mat_ref[off_emb:off_emb + V_pad, 0:E]            # (V_pad, E) bf16
        w_ih0 = mat_ref[off_ih0:off_ih0 + E, 0:H]                # (E, H)     bf16
        w_hh0 = mat_ref[off_hh0:off_hh0 + H, 0:H]                # (H, H)     bf16
        w_stk = [mat_ref[o:o + 2 * H, 0:H] for o in off_stack]   # (2H, H)    bf16
        w_fc = mat_ref[off_fc:off_fc + H, :]                     # (H, 128)   bf16

        bias0 = bias_ref[0:1, 0:H]                               # (1, H) f32
        bias_b = [jnp.broadcast_to(bias_ref[l:l + 1, 0:H], (B, H))
                  for l in range(1, L)]                          # hoisted (B, H)
        b_fc = bias_ref[L:L + 1, :]                              # (1, 128) f32

        # ---- fused embedding gather + layer-0 input projection (one-hot matmul,
        #      entirely off the recurrent critical path) -------------------------
        ids = idx_ref[...]                                       # (S*B, 1) int32
        iota = jax.lax.broadcasted_iota(jnp.int32, (S * B, V_pad), 1)
        onehot = (iota == ids).astype(bf16)                      # (S*B, V_pad)
        gathered = jnp.dot(onehot, emb_w,
                           preferred_element_type=f32)           # (S*B, E) exact
        x0 = jnp.dot(gathered.astype(bf16), w_ih0,
                     preferred_element_type=f32)                 # (S*B, H)
        x0 = x0 + jnp.broadcast_to(bias0, (S * B, H))            # bias folded once

        # ---- recurrence: serial over time (PyTorch default h_0 = 0) ----------
        h = [jnp.zeros((B, H), f32) for _ in range(L)]
        tops = []
        for t in range(S):
            # layer 0: input projection precomputed -> single recurrent matmul
            pre0 = x0[t * B:(t + 1) * B, :] + jnp.dot(
                h[0].astype(bf16), w_hh0, preferred_element_type=f32)
            h[0] = jnp.tanh(pre0)
            x_t = h[0]
            # layers >= 1: fused [x_t, h] @ [W_ih^T; W_hh^T] -> one MXU call
            for l in range(1, L):
                xh = jnp.concatenate([x_t, h[l]], axis=1).astype(bf16)   # (B, 2H)
                pre = jnp.dot(xh, w_stk[l - 1],
                              preferred_element_type=f32) + bias_b[l - 1]
                h[l] = jnp.tanh(pre)
                x_t = h[l]
            # output[:, -1, :] == last batch row of the top layer at step t
            tops.append(x_t[B - 1:B, :])                         # (1, H)

        top = jnp.concatenate(tops, axis=0) if S > 1 else tops[0]   # (S, H)

        # final Linear through the zero-padded (H, 128) fc weight: lane-dense store
        out_ref[...] = (
            jnp.dot(top.astype(bf16), w_fc, preferred_element_type=f32) + b_fc
        )

    return kernel


def rnn_forward_pallas(x_idx, emb_table, layer_params, w_fc, b_fc):
    """x_idx: int32 (S, B); returns float32 (S, output_dim)."""
    S, B = x_idx.shape
    V, E = emb_table.shape
    H = w_fc.shape[1]
    O = w_fc.shape[0]
    L = len(layer_params)
    V_pad = ((V + 15) // 16) * 16   # align the bf16 sublane tile (16 rows)

    def pad_to(a, rows):
        a = jnp.asarray(a, jnp.float32)
        out = jnp.zeros((rows, LANES), jnp.float32)
        return out.at[:a.shape[0], :a.shape[1]].set(a)

    # --- pack everything into one bf16 weight slab + one f32 bias slab (glue /
    #     parameter preparation; done once per set of weights) -----------------
    w_ih0, w_hh0, _, _ = layer_params[0]
    segs = [
        pad_to(emb_table, V_pad),        # rows [0, V_pad)        cols [0, E)
        pad_to(w_ih0.T, E),              # (E, H)                 cols [0, H)
        pad_to(w_hh0.T, H),              # (H, H)
    ]
    for l in range(1, L):
        w_ih, w_hh, _, _ = layer_params[l]
        segs.append(pad_to(jnp.concatenate([w_ih.T, w_hh.T], axis=0), 2 * H))
    segs.append(pad_to(w_fc.T, H))       # (H, O) in cols [0, O), rest zero
    mat_slab = jnp.concatenate(segs, axis=0).astype(jnp.bfloat16)

    bias_rows = [pad_to((b_ih + b_hh).reshape(1, H), 1)          # pre-summed
                 for (_, _, b_ih, b_hh) in layer_params]
    bias_rows.append(pad_to(jnp.asarray(b_fc).reshape(1, O), 1))
    bias_slab = jnp.concatenate(bias_rows, axis=0)               # (L+1, 128) f32

    idx2d = x_idx.reshape(S * B, 1).astype(jnp.int32)

    kernel = _make_rnn_kernel(S, B, E, H, O, L, V_pad)
    vmem = pl.BlockSpec(memory_space=pltpu.MemorySpace.VMEM)

    out_pad = pl.pallas_call(
        kernel,
        out_shape=jax.ShapeDtypeStruct((S, LANES), jnp.float32),
        in_specs=[vmem, vmem, vmem],
        out_specs=vmem,
    )(idx2d, mat_slab, bias_slab)
    return out_pad[:, :O]


def rnn_forward_ref(x_idx, emb_table, layer_params, w_fc, b_fc):
    """Pure-JAX f32 reference mirroring the PyTorch forward exactly."""
    S, B = x_idx.shape
    H = w_fc.shape[1]
    emb = jnp.take(emb_table, x_idx, axis=0).astype(jnp.float32)   # (S, B, E)
    h = [jnp.zeros((B, H), jnp.float32) for _ in layer_params]
    tops = []
    for t in range(S):
        x_t = emb[t]
        for l, (w_ih, w_hh, b_ih, b_hh) in enumerate(layer_params):
            h[l] = jnp.tanh(x_t @ w_ih.T + b_ih + h[l] @ w_hh.T + b_hh)
            x_t = h[l]
        tops.append(h[-1][B - 1])
    top = jnp.stack(tops)                                          # (S, H)
    return top @ w_fc.T + b_fc


if __name__ == "__main__":
    # Module hyper-parameters (small, consistent with the forward pass).
    max_val_possible = 50
    embedding_dim = 16
    hidden_dim = 32
    output_dim = 8
    num_layers_rnn = 2

    # Input: integer token tensor "batch" of shape (2, 8).
    S, B = 2, 8

    key = jax.random.PRNGKey(0)
    keys = jax.random.split(key, 4 + 4 * num_layers_rnn)

    x_idx = jax.random.randint(keys[0], (S, B), 0, max_val_possible, dtype=jnp.int32)
    emb_table = jax.random.normal(keys[1], (max_val_possible, embedding_dim),
                                  dtype=jnp.float32) * 0.1

    layer_params = []
    kidx = 2
    for l in range(num_layers_rnn):
        in_dim = embedding_dim if l == 0 else hidden_dim
        w_ih = jax.random.normal(keys[kidx + 0], (hidden_dim, in_dim), jnp.float32) * 0.1
        w_hh = jax.random.normal(keys[kidx + 1], (hidden_dim, hidden_dim), jnp.float32) * 0.1
        b_ih = jax.random.normal(keys[kidx + 2], (hidden_dim,), jnp.float32) * 0.1
        b_hh = jax.random.normal(keys[kidx + 3], (hidden_dim,), jnp.float32) * 0.1
        layer_params.append((w_ih, w_hh, b_ih, b_hh))
        kidx += 4

    w_fc = jax.random.normal(keys[kidx], (output_dim, hidden_dim), jnp.float32) * 0.1
    b_fc = jax.random.normal(keys[kidx + 1], (output_dim,), jnp.float32) * 0.1

    out = rnn_forward_pallas(x_idx, emb_table, layer_params, w_fc, b_fc)
    out = jax.block_until_ready(out)

    ref = rnn_forward_ref(x_idx, emb_table, layer_params, w_fc, b_fc)
    assert out.shape == (S, output_dim)
    # Kernel uses bf16 matmul operands (f32 accumulation); reference is pure f32,
    # hence the slightly relaxed tolerance (observed error is ~1e-3).
    assert jnp.allclose(out, ref, atol=2e-2, rtol=2e-2), (out, ref)

    print("KERNEL_OK")
</pallas_src>

<mosaic_0001>
module attributes {stable_mosaic.version = 11 : i64} {
  func.func @kernel(%arg0: memref<16x1xi32, #tpu.memory_space<vmem>>, %arg1: memref<208x128xbf16, #tpu.memory_space<vmem>>, %arg2: memref<3x128xf32, #tpu.memory_space<vmem>>, %arg3: memref<2x128xf32, #tpu.memory_space<vmem>>) attributes {dimension_semantics = [], scalar_prefetch = 0 : i64, scratch_operands = 0 : i64, tpu.core_type = #tpu.core_type<tc>} {
    %c0 = arith.constant 0 : index
    %c0_0 = arith.constant 0 : index
    %0 = vector.load %arg1[%c0, %c0_0] : memref<208x128xbf16, #tpu.memory_space<vmem>>, vector<64x16xbf16>
    %c64 = arith.constant 64 : index
    %c0_1 = arith.constant 0 : index
    %1 = vector.load %arg1[%c64, %c0_1] : memref<208x128xbf16, #tpu.memory_space<vmem>>, vector<16x32xbf16>
    %c80 = arith.constant 80 : index
    %c0_2 = arith.constant 0 : index
    %2 = vector.load %arg1[%c80, %c0_2] : memref<208x128xbf16, #tpu.memory_space<vmem>>, vector<32x32xbf16>
    %c112 = arith.constant 112 : index
    %c0_3 = arith.constant 0 : index
    %3 = vector.load %arg1[%c112, %c0_3] : memref<208x128xbf16, #tpu.memory_space<vmem>>, vector<64x32xbf16>
    %c176 = arith.constant 176 : index
    %c0_4 = arith.constant 0 : index
    %4 = vector.load %arg1[%c176, %c0_4] : memref<208x128xbf16, #tpu.memory_space<vmem>>, vector<32x128xbf16>
    %c0_5 = arith.constant 0 : index
    %c0_6 = arith.constant 0 : index
    %5 = vector.load %arg2[%c0_5, %c0_6] : memref<3x128xf32, #tpu.memory_space<vmem>>, vector<1x32xf32>
    %c1 = arith.constant 1 : index
    %c0_7 = arith.constant 0 : index
    %6 = vector.load %arg2[%c1, %c0_7] : memref<3x128xf32, #tpu.memory_space<vmem>>, vector<1x32xf32>
    %7 = vector.shape_cast %6 : vector<1x32xf32> to vector<1x32xf32>
    %8 = vector.broadcast %7 : vector<1x32xf32> to vector<8x32xf32>
    %c2 = arith.constant 2 : index
    %c0_8 = arith.constant 0 : index
    %9 = vector.load %arg2[%c2, %c0_8] : memref<3x128xf32, #tpu.memory_space<vmem>>, vector<1x128xf32>
    %c0_9 = arith.constant 0 : index
    %c0_10 = arith.constant 0 : index
    %10 = vector.load %arg0[%c0_9, %c0_10] : memref<16x1xi32, #tpu.memory_space<vmem>>, vector<16x1xi32>
    %11 = tpu.iota {dimensions = array<i32: 1>} : vector<16x64xi32>
    %12 = vector.broadcast %10 : vector<16x1xi32> to vector<16x64xi32>
    %13 = arith.cmpi eq, %11, %12 : vector<16x64xi32>
    %14 = arith.extui %13 : vector<16x64xi1> to vector<16x64xi32>
    %15 = arith.sitofp %14 : vector<16x64xi32> to vector<16x64xf32>
    %16 = arith.truncf %15 : vector<16x64xf32> to vector<16x64xbf16>
    %cst = arith.constant dense<0.000000e+00> : vector<16x16xf32>
    %17 = tpu.matmul %16, %0, %cst {dimension_numbers = #tpu.dot_dimension_numbers<[1], [0], [0], [1], [0, 0, 1, 1], [], []>} : vector<16x64xbf16>, vector<64x16xbf16>, vector<16x16xf32> -> vector<16x16xf32>
    %18 = arith.truncf %17 : vector<16x16xf32> to vector<16x16xbf16>
    %cst_11 = arith.constant dense<0.000000e+00> : vector<16x32xf32>
    %19 = tpu.matmul %18, %1, %cst_11 {dimension_numbers = #tpu.dot_dimension_numbers<[1], [0], [0], [1], [0, 0, 1, 1], [], []>} : vector<16x16xbf16>, vector<16x32xbf16>, vector<16x32xf32> -> vector<16x32xf32>
    %20 = vector.shape_cast %5 : vector<1x32xf32> to vector<1x32xf32>
    %21 = vector.broadcast %20 : vector<1x32xf32> to vector<16x32xf32>
    %22 = arith.addf %19, %21 : vector<16x32xf32>
    %cst_12 = arith.constant 0.000000e+00 : f32
    %23 = vector.broadcast %cst_12 : f32 to vector<8x32xf32>
    %cst_13 = arith.constant 0.000000e+00 : f32
    %24 = vector.broadcast %cst_13 : f32 to vector<8x32xf32>
    %25 = vector.extract_strided_slice %22 {offsets = [0, 0], sizes = [8, 32], strides = [1, 1]} : vector<16x32xf32> to vector<8x32xf32>
    %26 = arith.truncf %23 : vector<8x32xf32> to vector<8x32xbf16>
    %cst_14 = arith.constant dense<0.000000e+00> : vector<8x32xf32>
    %27 = tpu.matmul %26, %2, %cst_14 {dimension_numbers = #tpu.dot_dimension_numbers<[1], [0], [0], [1], [0, 0, 1, 1], [], []>} : vector<8x32xbf16>, vector<32x32xbf16>, vector<8x32xf32> -> vector<8x32xf32>
    %28 = arith.addf %25, %27 : vector<8x32xf32>
    %29 = math.tanh %28 : vector<8x32xf32>
    %30 = tpu.concatenate %29, %24 in 1 : vector<8x32xf32>, vector<8x32xf32> -> vector<8x64xf32>
    %31 = arith.truncf %30 : vector<8x64xf32> to vector<8x64xbf16>
    %cst_15 = arith.constant dense<0.000000e+00> : vector<8x32xf32>
    %32 = tpu.matmul %31, %3, %cst_15 {dimension_numbers = #tpu.dot_dimension_numbers<[1], [0], [0], [1], [0, 0, 1, 1], [], []>} : vector<8x64xbf16>, vector<64x32xbf16>, vector<8x32xf32> -> vector<8x32xf32>
    %33 = arith.addf %32, %8 : vector<8x32xf32>
    %34 = math.tanh %33 : vector<8x32xf32>
    %35 = vector.extract_strided_slice %34 {offsets = [7, 0], sizes = [1, 32], strides = [1, 1]} : vector<8x32xf32> to vector<1x32xf32>
    %36 = vector.extract_strided_slice %22 {offsets = [8, 0], sizes = [8, 32], strides = [1, 1]} : vector<16x32xf32> to vector<8x32xf32>
    %37 = arith.truncf %29 : vector<8x32xf32> to vector<8x32xbf16>
    %cst_16 = arith.constant dense<0.000000e+00> : vector<8x32xf32>
    %38 = tpu.matmul %37, %2, %cst_16 {dimension_numbers = #tpu.dot_dimension_numbers<[1], [0], [0], [1], [0, 0, 1, 1], [], []>} : vector<8x32xbf16>, vector<32x32xbf16>, vector<8x32xf32> -> vector<8x32xf32>
    %39 = arith.addf %36, %38 : vector<8x32xf32>
    %40 = math.tanh %39 : vector<8x32xf32>
    %41 = tpu.concatenate %40, %34 in 1 : vector<8x32xf32>, vector<8x32xf32> -> vector<8x64xf32>
    %42 = arith.truncf %41 : vector<8x64xf32> to vector<8x64xbf16>
    %cst_17 = arith.constant dense<0.000000e+00> : vector<8x32xf32>
    %43 = tpu.matmul %42, %3, %cst_17 {dimension_numbers = #tpu.dot_dimension_numbers<[1], [0], [0], [1], [0, 0, 1, 1], [], []>} : vector<8x64xbf16>, vector<64x32xbf16>, vector<8x32xf32> -> vector<8x32xf32>
    %44 = arith.addf %43, %8 : vector<8x32xf32>
    %45 = math.tanh %44 : vector<8x32xf32>
    %46 = vector.extract_strided_slice %45 {offsets = [7, 0], sizes = [1, 32], strides = [1, 1]} : vector<8x32xf32> to vector<1x32xf32>
    %47 = tpu.concatenate %35, %46 in 0 : vector<1x32xf32>, vector<1x32xf32> -> vector<2x32xf32>
    %48 = arith.truncf %47 : vector<2x32xf32> to vector<2x32xbf16>
    %cst_18 = arith.constant dense<0.000000e+00> : vector<2x128xf32>
    %49 = tpu.matmul %48, %4, %cst_18 {dimension_numbers = #tpu.dot_dimension_numbers<[1], [0], [0], [1], [0, 0, 1, 1], [], []>} : vector<2x32xbf16>, vector<32x128xbf16>, vector<2x128xf32> -> vector<2x128xf32>
    %50 = vector.broadcast %9 : vector<1x128xf32> to vector<2x128xf32>
    %51 = arith.addf %49, %50 : vector<2x128xf32>
    %c0_19 = arith.constant 0 : index
    %c0_20 = arith.constant 0 : index
    %52 = vector.load %arg3[%c0_19, %c0_20] : memref<2x128xf32, #tpu.memory_space<vmem>>, vector<2x128xf32>
    tpu.vector_store %arg3[%c0_19, %c0_20], %51 {strides = array<i32>} : memref<2x128xf32, #tpu.memory_space<vmem>>, vector<2x128xf32>,
    return
  }
}

</mosaic_0001>

<bundles_post_ra>
// kernel: tpu_custom_call.1
= control target key start
LH: loop header
LB: loop body
LE: loop exit
PB: predicated region body
PF: predicated region fallthrough
CT: control target
= control target key end

     0   :  { %8 = vsyncpa [#allocation3], 0  ;;  %s815_s0 = inlined_call_operand.vmem [shape: s32[16,1], index: 0, kind: input, shape index: {}]   ;;  %s816_s1 = inlined_call_operand.hbm [shape: bf16[208,128], index: 1, kind: input, shape index: {}]   ;;  %s817_s2 = inlined_call_operand.vmem [shape: f32[3,128], index: 2, kind: input, shape index: {}]   ;;  %s818_s3 = inlined_call_operand.hbm [shape: f32[2,128], index: 3, kind: output, shape index: {}]  }
   0x1   :  { %9 = vsyncpa [#allocation4], 0  ;;  %s706_s12 = smov [#allocation2]   ;;  %s658_s16 = scalar_lea.hbm %s816_s1, 1664 }
   0x2   :  { %s17_s13 = sshll.u32 %s706_s12, 4  ;;  %p659_p0 = scmp.ne.s32.totalorder %s816_s1, %s658_s16  ;;  %s18_s13 = int_to_ptr.vmem [resolvable:$true] %s17_s13 }
   0x3   :  { %p662_p1 = scmp.lt.u32.totalorder %s658_s16, %s816_s1 }
   0x5   :  { %p664_p2 = pnand %p662_p1, %p659_p0 }
   0x7   :  { %667 = shalt.err (!%p664_p2)
}
   0x8   :  { %s668_s21 = scalar_lea.vmem %s18_s13, 1664  ;;  %p673_p4 = scmp.lt.s32.totalorder %s18_s13, %s18_s13 }
   0x9   :  { %p669_p3 = scmp.ne.s32.totalorder %s18_s13, %s668_s21  ;;  %p674_p5 = scmp.lt.s32.totalorder %s668_s21, %s668_s21 }
   0xb   :  { %p675_p6 = por %p674_p5, %p673_p4 }
   0xd   :  { %p676_p7 = pnand %p675_p6, %p669_p3 }
   0xf   :  { %679 = shalt.err (!%p676_p7)
}
  0x10   :  { %s707_s22 = smov 64   ;;  %s708_s23 = smov 4  }
  0x11   :  { %23 = dma.hbm_to_vmem [thread:$0]  %s816_s1, 1664, %s18_s13, [#allocation3], %s707_s22, %s707_s22, %s708_s23  }
  0x12   :  { %702 = dma.done.wait [#allocation3], 1664  }
  0x13   :  { %703 = vsyncadd [#allocation3], 4294965632  ;;  %v709_v0 = vmov 0   ;;  %v710_v1 = vmov 0.0   ;;  %v63_v2 = vld [vmem:[%s815_s0] sm:$0xff]  ;;  %v637_v3 = vld [vmem:[#allocation2] sm:$0xff]   ;;  %v65_v8 = vlaneseq }
  0x14   :  { %636 = vset.pattern.permute.xlu0 %v709_v0  ;;  %562 = vmatprep.subr.bf16.mxu0 %v710_v1  ;;  %v64_v4 = vld [vmem:[%s815_s0 + $0x8] sm:$0xff]  ;;  %v638_v5 = vld [vmem:[#allocation2 + $0x8] sm:$0xff]   ;;  %vm711_vm0 = vmmov 0   ;;  %v640_v7 = vld [vmem:[#allocation2 + $0x18] sm:$0xff]   ;;  %vm104_vm3 = vcmask 523264   ;;  %vm160_vm4 = vcmask 130048  }
  0x15   :  { %574 = vmatprep.subr.bf16.mxu1 %v710_v1  ;;  %68 = vperm.xlu0 %636, %v63_v2   ;;  %v639_v6 = vld [vmem:[#allocation2 + $0x10] sm:$0xff]   ;;  %v66_v9 = vand.u32 127, %v65_v8  ;;  %v641_v15 = vld [vmem:[#allocation2 + $0x20] sm:$0xff]   ;;  %v642_v16 = vld [vmem:[#allocation2 + $0x28] sm:$0xff]   ;;  %vm217_vm5 = vcmask 261120   ;;  %s712_s5 = smov 32  }
  0x16   :  { %563 = vmatpush3.bf16.msra.mxu0 %v637_v3  ;;  %570 = vmatprep.mubr.msk.bf16.mxu0 %vm711_vm0, %v710_v1  ;;  %v643_v17 = vld [vmem:[#allocation2 + $0x30] sm:$0xff]   ;;  %v644_v23 = vld [vmem:[#allocation2 + $0x38] sm:$0xff]   ;;  %v645_v24 = vld [vmem:[#allocation2 + $0x40] sm:$0xff]   ;;  %vm434_vm6 = vcmask 1040384   ;;  %s713_s8 = smov [#allocation5]  }
  0x17   :  { %564 = vmatprep.subr.bf16.mxu0 %v710_v1  ;;  %576 = vmatprep.mubr.msk.bf16.mxu1 %vm711_vm0, %v710_v1  ;;  %v646_v25 = vld [vmem:[#allocation2 + $0x48] sm:$0xff]   ;;  %v647_v26 = vld [vmem:[#allocation2 + $0x50] sm:$0xff]   ;;  %v648_v59 = vld [vmem:[#allocation2 + $0x58] sm:$0xff]   ;;  %s503_s9 = sshll.u32 %s713_s8, 4  ;;  %s504_s9 = int_to_ptr.vmem [resolvable:$true] %s503_s9 }
  0x18   :  { %575 = vmatpush3.bf16.msra.mxu1 %v641_v15  ;;  %v520_v29 = vld [vmem:[%s817_s2] ss:$0 sm:$0xff]  ;;  %v512_v43 = vld [vmem:[%s817_s2 + $0x1] ss:$0 sm:$0xff]  ;;  %v649_v60 = vld [vmem:[#allocation2 + $0x60] sm:$0xff]   ;;  %s680_s10 = scalar_lea.vmem %s504_s9, 32  ;;  %p685_p9 = scmp.lt.s32.totalorder %s504_s9, %s504_s9 }
  0x19   :  { %71 = vperm.xlu0 %636, %v64_v4   ;;  %580 = vmatprep.subr.bf16.mxu1 %v710_v1  ;;  %p681_p8 = scmp.ne.s32.totalorder %s504_s9, %s680_s10  ;;  %p686_p10 = scmp.lt.s32.totalorder %s680_s10, %s680_s10 }
  0x1a   :  { %565 = vmatpush3.bf16.msra.mxu0 %v638_v5 }
  0x1b   :  { %566 = vmatprep.subr.bf16.mxu0 %v710_v1  ;;  %p687_p11 = por %p686_p10, %p685_p9 }
  0x1d   :  { %p688_p12 = pnand %p687_p11, %p681_p8 }
  0x1e   :  { %567 = vmatpush3.bf16.msra.mxu0 %v639_v6 }
  0x1f   :  { %568 = vmatprep.subr.bf16.mxu0 %v710_v1 }
  0x22   :  { %569 = vmatpush3.bf16.msra.mxu0 %v640_v7 }
  0x23   :  { %600 = vmatprep.subr.bf16.mxu0 %v710_v1 }
  0x94   :  { %v69_v10 = vpop.permute.xlu0 %68 }
  0x95   :  { %vm73_vm1 = vcmp.eq.s32.totalorder %v66_v9, %v69_v10 }
  0x96   :  { %v513_v12 = vsel %vm73_vm1, 1.0, %v710_v1 }
  0x98   :  { %v72_v11 = vpop.permute.xlu0 %71 }
  0x99   :  { %vm74_vm2 = vcmp.eq.s32.totalorder %v66_v9, %v72_v11 }
  0x9a   :  { %v514_v13 = vsel %vm74_vm2, 1.0, %v710_v1 }
  0x9b   :  { %v79_v14 = vpack.c.bf16 %v514_v13, %v513_v12 }
  0x9d   :  { %571 = vmatmul.mubr.msk.bf16.vlgmr.msra.gmra.mrb[0].mxu0 %vm104_vm3, %v79_v14 }
  0x9e   :  { %604 = vmatprep.mubr.msk.bf16.mxu0 %vm711_vm0, %v710_v1  ;;  %601 = vmatpush3.bf16.msra.mxu0 %v642_v16 }
  0x9f   :  { %602 = vmatprep.subr.bf16.mxu0 %v710_v1 }
  0xa2   :  { %603 = vmatpush3.bf16.msra.mxu0 %v643_v17 }
  0xa3   :  { %608 = vmatprep.subr.bf16.mxu0 %v710_v1 }
 0x170   :  { %v142_v18 = vpop.f32.mrb[0].mxu0 }
 0x171   :  { %v572_v19 = vpop.f32.mrb[1].mxu0 }
 0x172   :  { %v145_v20 = vpop.f32.mrb[2].mxu0 }
 0x173   :  { %v149_v21 = vpack.c.bf16 %v145_v20, %v142_v18  ;;  %v573_v22 = vpop.f32.mrb[3].mxu0 }
 0x175   :  { %577 = vmatmul.mubr.msk.bf16.vlgmr.msra.gmra.mrb[0].mxu1 %vm160_vm4, %v149_v21 }
 0x176   :  { %581 = vmatpush3.bf16.msra.mxu1 %v642_v16  ;;  %584 = vmatprep.mubr.msk.bf16.mxu1 %vm711_vm0, %v710_v1 }
 0x177   :  { %582 = vmatprep.subr.bf16.mxu1 %v710_v1 }
 0x17a   :  { %583 = vmatpush3.bf16.msra.mxu1 %v643_v17 }
 0x17b   :  { %588 = vmatprep.subr.bf16.mxu1 %v710_v1 }
 0x17d   :  { %585 = vmatmul.mubr.bf16.vlgmr.msra.gmra.mrb[4].mxu1 %v709_v0 }
 0x17e   :  { %596 = vmatprep.mubr.msk.bf16.mxu1 %vm711_vm0, %v710_v1  ;;  %589 = vmatpush3.bf16.msra.mxu1 %v644_v23 }
 0x17f   :  { %590 = vmatprep.subr.bf16.mxu1 %v710_v1 }
 0x182   :  { %591 = vmatpush3.bf16.msra.mxu1 %v645_v24 }
 0x183   :  { %592 = vmatprep.subr.bf16.mxu1 %v710_v1 }
 0x186   :  { %593 = vmatpush3.bf16.msra.mxu1 %v646_v25 }
 0x187   :  { %594 = vmatprep.subr.bf16.mxu1 %v710_v1 }
 0x18a   :  { %595 = vmatpush3.bf16.msra.mxu1 %v647_v26 }
 0x18b   :  { %620 = vmatprep.subr.bf16.mxu1 %v710_v1 }
 0x248   :  { %v198_v27 = vpop.f32.mrb[0].mxu1 }
 0x249   :  { %v578_v28 = vpop.f32.mrb[1].mxu1  ;;  %v199_v33 = vadd.f32 %v520_v29, %v198_v27 }
 0x24a   :  { %v201_v30 = vpop.f32.mrb[2].mxu1 }
 0x24b   :  { %v202_v31 = vadd.f32 %v520_v29, %v201_v30  ;;  %v579_v32 = vpop.f32.mrb[3].mxu1 }
 0x250   :  { %v255_v34 = vpop.f32.mrb[4].mxu1 }
 0x251   :  { %v261_v35 = vadd.f32 %v255_v34, %v199_v33  ;;  %v586_v36 = vpop.f32.mrb[5].mxu1 }
 0x252   :  { %v258_v37 = vpop.f32.mrb[6].mxu1 }
 0x253   :  { %650 = vtanh.f32 %v261_v35  ;;  %v587_v38 = vpop.f32.mrb[7].mxu1 }
 0x25d   :  { %v651_v39 = vpop.eup %650 }
 0x25e   :  { %v263_v40 = vsel %vm217_vm5, %v651_v39, 0.0  ;;  %v333_v41 = vpack.c.bf16 %v651_v39, %v651_v39 }
 0x25f   :  { %v264_v42 = vpack.c.bf16 %v263_v40, %v263_v40 }
 0x260   :  { %605 = vmatmul.mubr.msk.bf16.vlgmr.msra.gmra.mrb[4].mxu0 %vm217_vm5, %v333_v41 }
 0x261   :  { %597 = vmatmul.mubr.msk.bf16.vlgmr.msra.gmra.mrb[8].mxu1 %vm104_vm3, %v264_v42  ;;  %609 = vmatpush3.bf16.msra.mxu0 %v644_v23 }
 0x262   :  { %610 = vmatprep.subr.bf16.mxu0 %v710_v1  ;;  %616 = vmatprep.mubr.msk.bf16.mxu0 %vm711_vm0, %v710_v1 }
 0x263   :  { %624 = vmatprep.mubr.msk.bf16.mxu1 %vm711_vm0, %v710_v1  ;;  %621 = vmatpush3.bf16.msra.mxu1 %v648_v59 }
 0x264   :  { %622 = vmatprep.subr.bf16.mxu1 %v710_v1 }
 0x265   :  { %611 = vmatpush3.bf16.msra.mxu0 %v645_v24 }
 0x266   :  { %612 = vmatprep.subr.bf16.mxu0 %v710_v1 }
 0x267   :  { %623 = vmatpush3.bf16.msra.mxu1 %v649_v60 }
 0x269   :  { %613 = vmatpush3.bf16.msra.mxu0 %v646_v25 }
 0x26a   :  { %614 = vmatprep.subr.bf16.mxu0 %v710_v1  ;;  %v532_v1 = vld [vmem:[%s817_s2 + $0x2] ss:$0 sm:$0xff] }
 0x26d   :  { %615 = vmatpush3.bf16.msra.mxu0 %v647_v26 }
 0x333   :  { %v371_v44 = vpop.f32.mrb[4].mxu0 }
 0x334   :  { %v377_v45 = vadd.f32 %v371_v44, %v202_v31  ;;  %v326_v46 = vpop.f32.mrb[8].mxu1  ;;  %v606_v47 = vpop.f32.mrb[5].mxu0 }
 0x335   :  { %v327_v48 = vadd.f32 %v512_v43, %v326_v46  ;;  %v598_v49 = vpop.f32.mrb[9].mxu1  ;;  %v374_v50 = vpop.f32.mrb[6].mxu0 }
 0x336   :  { %v329_v51 = vpop.f32.mrb[10].mxu1  ;;  %v607_v52 = vpop.f32.mrb[7].mxu0 }
 0x337   :  { %652 = vtanh.f32 %v327_v48  ;;  %v599_v53 = vpop.f32.mrb[11].mxu1 }
 0x338   :  { %654 = vtanh.f32 %v377_v45 }
 0x341   :  { %v653_v54 = vpop.eup %652 }
 0x342   :  { %380 = vrot.lane.b32.xlu1 %v653_v54, %s712_s5  ;;  %v655_v55 = vpop.eup %654  ;;  %v429_v4 = vrot.slane %v653_v54, 7 }
 0x3b4   :  { %v381_v56 = vpop.permute.xlu1 %380 }
 0x3b5   :  { %v383_v57 = vsel %vm217_vm5, %v655_v55, %v381_v56 }
 0x3b6   :  { %v384_v58 = vpack.c.bf16 %v383_v57, %v383_v57 }
 0x3b8   :  { %617 = vmatmul.mubr.msk.bf16.vlgmr.msra.gmra.mrb[8].mxu0 %vm104_vm3, %v384_v58 }
 0x48b   :  { %v422_v61 = vpop.f32.mrb[8].mxu0 }
 0x48c   :  { %v423_v62 = vadd.f32 %v512_v43, %v422_v61  ;;  %v618_v63 = vpop.f32.mrb[9].mxu0 }
 0x48d   :  { %v425_v0 = vpop.f32.mrb[10].mxu0 }
 0x48e   :  { %656 = vtanh.f32 %v423_v62  ;;  %v619_v2 = vpop.f32.mrb[11].mxu0 }
 0x498   :  { %v657_v3 = vpop.eup %656 }
 0x499   :  { %v432_v5 = vrot.slane %v657_v3, 6 }
 0x49b   :  { %v435_v6 = vsel %vm434_vm6, %v429_v4, %v432_v5 }
 0x49c   :  { %v436_v7 = vpack.c.bf16 %v435_v6, %v435_v6 }
 0x49e   :  { %625 = vmatmul.mubr.msk.bf16.vlgmr.msra.gmra.mrb[12].mxu1 %vm217_vm5, %v436_v7 }
 0x571   :  { %v490_v8 = vpop.f32.mrb[12].mxu1 }
 0x572   :  { %v491_v9 = vadd.f32 %v532_v1, %v490_v8  ;;  %v626_v10 = vpop.f32.mrb[13].mxu1 }
 0x573   :  { %v493_v11 = vpop.f32.mrb[14].mxu1 }
 0x574   :  { %496 = vst [vmem:[#allocation5] sm:$0x3] %v491_v9  ;;  %v627_v12 = vpop.f32.mrb[15].mxu1 }
 0x575   :  { %691 = shalt.err (!%p688_p12)
}
 0x576   :  { %s692_s2 = scalar_lea.hbm %s818_s3, 32 }
 0x577   :  { %p693_p13 = scmp.ne.s32.totalorder %s818_s3, %s692_s2  ;;  %p696_p0 = scmp.lt.u32.totalorder %s692_s2, %s818_s3 }
 0x579   :  { %p698_p1 = pnand %p696_p0, %p693_p13 }
 0x57b   :  { %701 = shalt.err (!%p698_p1)
}
 0x57c   :  { %506 = dma.vmem_to_hbm [thread:$0]  %s504_s9, 32, %s818_s3, [#allocation4]  }
 0x57d   :  { %704 = dma.done.wait [#allocation4], 32  }
 0x57e   :  { %705 = vsyncadd [#allocation4], 4294967264 }
 0x57f   :  { %510 = vsyncpa [#allocation3], 1 }
 0x580   :  { %511 = vsyncpa [#allocation4], 1 }

</bundles_post_ra>
